<compile_context>
chip_gen: v6e
topology: v6e:2x2x1
jax: 0.10.0
libtpu: 0.0.40
codegen_flags: <defaults>
</compile_context>

<pallas_src>
import math

import jax
import jax.numpy as jnp
from jax.experimental import pallas as pl
from jax.experimental.pallas import tpu as pltpu

_LANES = 128
_SMALL_FALLBACK_BYTES = 4 * 1024 * 1024   # below this, plain XLA multiply wins
_TARGET_BLOCK_BYTES = 6 * 1024 * 1024     # per-block target (x2 arrays x2 buffers ~24 MiB)
_MAX_BLOCK_BYTES = 8 * 1024 * 1024        # give up on (B, tn) blocking past this


def _drop_path_kernel(s_ref, x_ref, o_ref):
    """One grid step handles one lane-dense (B, tn) tile of the flattened tensor.

    s_ref : (B, 1) VMEM, per-batch scale (0 or 1/keep_prob) in x's dtype; resident
            across all grid steps (index_map always returns block (0, 0)).
    x_ref : (B, tn) VMEM input tile.
    o_ref : (B, tn) VMEM output tile.
    """
    o_ref[...] = x_ref[...] * s_ref[...]


def drop_path(x, drop_prob, key, training=True, force_pallas=False):
    """JAX/Pallas equivalent of DropPath.forward (drop_prob must be a static float)."""
    if (not training) or drop_prob == 0.0:
        return x

    B = x.shape[0]
    if drop_prob >= 1.0:
        # keep_prob == 0: every sample is dropped. (The reference x.div(0)*0 would give
        # NaN; returning zeros is the sane stochastic-depth limit.)
        return jnp.zeros_like(x)

    keep_prob = 1.0 - float(drop_prob)
    N = math.prod(x.shape[1:])
    itemsize = jnp.dtype(x.dtype).itemsize

    # Glue: per-batch uniform draws (PyTorch uses torch.rand on shape (B,1,...,1)).
    u = jax.random.uniform(key, (B,), dtype=jnp.float32)
    # mask = floor(keep_prob + U) -> 1.0 with prob keep_prob, else 0.0; fold 1/keep_prob
    # into a single per-batch scalar and cast to the tensor's native dtype.
    scale = (jnp.floor(keep_prob + u) * (1.0 / keep_prob)).astype(x.dtype)

    total_bytes = B * N * itemsize
    min_block_bytes = B * _LANES * itemsize
    if (not force_pallas) and (
        total_bytes < _SMALL_FALLBACK_BYTES or min_block_bytes > _MAX_BLOCK_BYTES
    ):
        # Small activation (kernel launch + pipeline prime dominates) or batch too large
        # for a lane-dense (B, tn) block: let XLA fuse the elementwise multiply.
        return x * scale.reshape((B,) + (1,) * (x.ndim - 1))

    # ---- lane-dense, pad-free layout: (B, N) view, tile flat features by 128s -------
    x2 = x.reshape(B, N)          # free: contiguous view, no HBM traffic
    s2 = scale.reshape(B, 1)

    # Block width: target ~6 MiB per block, multiple of 128 lanes, but never wider than
    # half the (128-aligned) feature axis so the grid has >= 2 points (v7x dual-TC).
    tn_budget = max(_LANES, ((_TARGET_BLOCK_BYTES // (B * itemsize)) // _LANES) * _LANES)
    tn_half = pl.cdiv(pl.cdiv(N, 2), _LANES) * _LANES
    tn = int(min(tn_budget, max(_LANES, tn_half)))
    grid = (pl.cdiv(N, tn),)      # last block may be partial -> masked vld/vst

    out2 = pl.pallas_call(
        _drop_path_kernel,
        out_shape=jax.ShapeDtypeStruct((B, N), x.dtype),
        grid=grid,
        in_specs=[
            # per-batch scale column: same block every step -> stays resident in VMEM
            pl.BlockSpec((B, 1), lambda j: (0, 0)),
            # lane-dense elementwise hot path
            pl.BlockSpec((B, tn), lambda j: (0, j)),
        ],
        out_specs=pl.BlockSpec((B, tn), lambda j: (0, j)),
        compiler_params=pltpu.CompilerParams(
            # single parallel axis: v7x shards blocks across both TensorCores,
            # neutral on v5e/v6e (single TC).
            dimension_semantics=("parallel",),
            vmem_limit_bytes=40 * 1024 * 1024,
        ),
    )(s2, x2)

    return out2.reshape(x.shape)


if __name__ == "__main__":
    key = jax.random.PRNGKey(0)
    kx, kmask, kx2 = jax.random.split(key, 3)

    # Small NCHW input consistent with the module's usage; force the Pallas path so the
    # kernel itself is exercised (the auto path would use the small-tensor fallback).
    x = jax.random.normal(kx, (2, 4, 16, 16), dtype=jnp.float32)
    drop_prob = 0.5
    keep_prob = 1.0 - drop_prob

    out = jax.block_until_ready(
        drop_path(x, drop_prob, kmask, training=True, force_pallas=True)
    )

    # Reference (plain JAX) using the same uniform draws.
    u = jax.random.uniform(kmask, (x.shape[0],), dtype=jnp.float32)
    mask = jnp.floor(keep_prob + u).reshape((x.shape[0],) + (1,) * (x.ndim - 1))
    ref = (x / keep_prob) * mask
    assert out.shape == x.shape and out.dtype == x.dtype
    assert jnp.allclose(out, ref, atol=1e-6, rtol=1e-6)

    # bf16 input with a feature count that is NOT a multiple of 128
    # (exercises the masked partial final block and the native-dtype multiply).
    x2 = jax.random.normal(kx2, (2, 3, 5, 7), dtype=jnp.bfloat16)
    dp2 = 0.25
    out2 = jax.block_until_ready(
        drop_path(x2, dp2, kmask, training=True, force_pallas=True)
    )
    u2 = jax.random.uniform(kmask, (x2.shape[0],), dtype=jnp.float32)
    mask2 = jnp.floor((1.0 - dp2) + u2).reshape((x2.shape[0],) + (1,) * (x2.ndim - 1))
    ref2 = (x2.astype(jnp.float32) / (1.0 - dp2)) * mask2
    assert out2.shape == x2.shape and out2.dtype == x2.dtype
    # bf16 scale rounding (multiply in native dtype) -> loosened tolerance.
    assert jnp.allclose(out2.astype(jnp.float32), ref2, atol=1e-2, rtol=1e-2)

    # Auto path on a small tensor (fused XLA fallback) -> same semantics.
    out3 = jax.block_until_ready(drop_path(x, drop_prob, kmask, training=True))
    assert jnp.allclose(out3, ref, atol=1e-6, rtol=1e-6)

    # Eval path / drop_prob == 0 -> identity; drop_prob == 1 -> zeros (guarded).
    assert jnp.array_equal(drop_path(x, drop_prob, kmask, training=False), x)
    assert jnp.array_equal(drop_path(x, 0.0, kmask, training=True), x)
    assert jnp.array_equal(drop_path(x, 1.0, kmask, training=True), jnp.zeros_like(x))

    print("KERNEL_OK")
</pallas_src>

<mosaic_0001>
module attributes {stable_mosaic.version = 11 : i64} {
  func.func @_drop_path_kernel(%arg0: i32, %arg1: memref<2x1xf32, #tpu.memory_space<vmem>>, %arg2: memref<2x512xf32, #tpu.memory_space<vmem>>, %arg3: memref<2x512xf32, #tpu.memory_space<vmem>>) attributes {dimension_semantics = [#tpu.dimension_semantics<parallel>], iteration_bounds = array<i64: 2>, scalar_prefetch = 0 : i64, scratch_operands = 0 : i64, tpu.core_type = #tpu.core_type<tc>, window_params = [{pipeline_mode = #tpu.pipeline_mode<synchronous>, transform_indices = @transform_0, window_bounds = array<i64: 2, 1>}, {transform_indices = @transform_1, window_bounds = array<i64: 2, 512>}, {transform_indices = @transform_2, window_bounds = array<i64: 2, 512>}]} {
    %c0 = arith.constant 0 : index
    %c0_0 = arith.constant 0 : index
    %0 = vector.load %arg2[%c0, %c0_0] : memref<2x512xf32, #tpu.memory_space<vmem>>, vector<2x512xf32>
    %c0_1 = arith.constant 0 : index
    %c0_2 = arith.constant 0 : index
    %1 = vector.load %arg1[%c0_1, %c0_2] : memref<2x1xf32, #tpu.memory_space<vmem>>, vector<2x1xf32>
    %2 = vector.broadcast %1 : vector<2x1xf32> to vector<2x512xf32>
    %3 = arith.mulf %0, %2 : vector<2x512xf32>
    %c0_3 = arith.constant 0 : index
    %c0_4 = arith.constant 0 : index
    %4 = vector.load %arg3[%c0_3, %c0_4] : memref<2x512xf32, #tpu.memory_space<vmem>>, vector<2x512xf32>
    tpu.vector_store %arg3[%c0_3, %c0_4], %3 {strides = array<i32>} : memref<2x512xf32, #tpu.memory_space<vmem>>, vector<2x512xf32>,
    return
  }
  func.func @transform_0(%arg0: i32) -> (i32, i32) {
    %c0_i32 = arith.constant 0 : i32
    %c0_i32_0 = arith.constant 0 : i32
    %c0_i32_1 = arith.constant 0 : i32
    return %c0_i32, %c0_i32_0 : i32, i32
  }
  func.func @transform_1(%arg0: i32) -> (i32, i32) {
    %c0_i32 = arith.constant 0 : i32
    %c0_i32_0 = arith.constant 0 : i32
    return %c0_i32, %arg0 : i32, i32
  }
  func.func @transform_2(%arg0: i32) -> (i32, i32) {
    %c0_i32 = arith.constant 0 : i32
    %c0_i32_0 = arith.constant 0 : i32
    return %c0_i32, %arg0 : i32, i32
  }
}

</mosaic_0001>

<bundles_post_ra>
// kernel: tpu_custom_call.1
= control target key start
LH: loop header
LB: loop body
LE: loop exit
PB: predicated region body
PF: predicated region fallthrough
CT: control target
= control target key end

     0   :  { %7 = vsyncpa [#allocation3], 0  ;;  %s585_s0 = inlined_call_operand.vmem [shape: f32[2,1], index: 0, kind: input, shape index: {}]   ;;  %s586_s1 = inlined_call_operand.hbm [shape: f32[2,1024], index: 1, kind: input, shape index: {}]   ;;  %s587_s2 = inlined_call_operand.hbm [shape: f32[2,1024], index: 2, kind: output, shape index: {}]  }
   0x1   :  { %9 = vsyncpa [#allocation3 + $0x1], 0 }
   0x2   :  { %10 = vsyncpa [#allocation4], 0 }
   0x3   :  { %12 = vsyncpa [#allocation4 + $0x1], 0  ;;  %s441_s9 = smov 0   ;;  %s443_s10 = smov 0  }
   0x4   :  { %s445_s11 = smov 0   ;;  %s447_s12 = smov 0  }
   0x5 LB: > { %s462_s13 = sadd.s32 4294967295, %s420_s12   ;;  %s263_s14 = sadd.s32 4294967294, %s420_s12   ;;  %s420_s12 = sphi %s447_s12, %s604_s12   ;;  %s416_s11 = sphi %s445_s11, %s603_s11   ;;  %s412_s10 = sphi %s443_s10, %s602_s10   ;;  %s408_s9 = sphi %s441_s9, %s601_s9  }
   0x6   : > { %s466_s15 = sadd.s32 1, %s420_s12   ;;  %s46_s16 = sadd.s32 1, %s416_s11 }
   0x7   : > { %s43_s17 = ssub.s32 %s420_s12, %s466_s15  ;;  %p53_p0 = scmp.ne.s32.totalorder %s416_s11, %s412_s10 }
   0x8   : > { %p44_p1 = scmp.eq.s32.totalorder %s43_s17, 0  ;;  %p54_p2 = scmp.eq.s32.totalorder %s420_s12, 0 }
   0x9   : > { %p59_p3 = scmp.ne.s32.totalorder %s412_s10, %s408_s9  ;;  %p60_p4 = scmp.eq.s32.totalorder %s462_s13, 0 }
   0xa   : > { %s478_s18 = scalar_select %p44_p1, %s416_s11, %s46_s16  }
   0xb   : > { %p480_p5 = por %p54_p2, %p53_p0  ;;  %p484_p6 = por %p60_p4, %p59_p3 }
   0xc   : > { %p83_p7 = scmp.eq.s32.totalorder %s462_s13, 1  ;;  %p89_p8 = scmp.eq.s32.totalorder %s263_s14, 1 }
   0xd   : > { %s591_s20 = scalar_select %p484_p6, 1, 0 }
   0xe   : > { %p291_p10 = scmp.lt.s32.totalorder %s420_s12, 2  ;;  %p491_p11 = por %p83_p7, %p53_p0 }
   0xf   : > { %p495_p12 = por %p89_p8, %p59_p3  ;;  %s112_s23 = sand.u32 1, %s416_s11  }
  0x10   : > { %s592_s21 = scalar_select %p491_p11, 1, 0 }
  0x11   : > { %s593_s22 = scalar_select %p495_p12, 1, 0 }
  0x12   : > { %s277_s24 = sshll.u32 %s420_s12, 7  ;;  %s266_s25 = sshll.u32 %s112_s23, 3 }
  0x13   : > { %s504_s28 = scalar_lea.hbm %s586_s1, %s277_s24  ;;  %s116_s29 = scalar_lea.vmem [#allocation2], %s266_s25 }
  0x14   : > { %s124_s30 = sshll.u32 %s116_s29, 4  ;;  %p508_p13 = pnand %p291_p10, %p480_p5  ;;  %s512_s30 = int_to_ptr.vmem [resolvable:$true] %s124_s30 }
  0x15   : > { %s113_s4 = scalar_lea.sflag [#allocation3], %s112_s23  ;;  %s328_s5 = scalar_lea.hbm %s504_s28, 128 }
  0x16   : > { %p329_p2 = scmp.ne.s32.totalorder %s504_s28, %s328_s5  ;;  %p330_p3 = pneg %p508_p13 }
  0x17   : > { %s333_s8 = scalar_lea.hbm %s586_s1, 256  ;;  %p334_p5 = scmp.lt.s32.totalorder %s504_s28, %s586_s1 }
  0x18   : > { %p331_p4 = pnand %p330_p3, %p329_p2  ;;  %p335_p8 = scmp.lt.s32.totalorder %s333_s8, %s328_s5 }
  0x1a   : > { %p332_p7 = pneg %p331_p4  ;;  %p336_p10 = por %p335_p8, %p334_p5 }
  0x1c   : > { %p337_p9 = pnand %p336_p10, %p332_p7 }
  0x1e   : > { %340 = shalt.err (!%p337_p9)
}
  0x1f   : > { %s341_s17 = scalar_lea.vmem %s512_s30, 128  ;;  %s422_s19 = smov [#allocation2]  }
  0x20   : > { %p342_p0 = scmp.ne.s32.totalorder %s512_s30, %s341_s17  ;;  %s346_s23 = sshll.u32 %s422_s19, 4  ;;  %s347_s23 = int_to_ptr.vmem [resolvable:$false] %s346_s23 }
  0x21   : > { %s348_s24 = scalar_lea.vmem %s347_s23, 256  ;;  %p349_p4 = scmp.lt.s32.totalorder %s512_s30, %s347_s23 }
  0x22   : > { %p344_p1 = pnand %p342_p0, %p330_p3  ;;  %p350_p12 = scmp.lt.s32.totalorder %s348_s24, %s341_s17 }
  0x24   : > { %p345_p2 = pneg %p344_p1  ;;  %p351_p11 = por %p350_p12, %p349_p4 }
  0x26   : > { %p352_p6 = pnand %p351_p11, %p345_p2 }
  0x28   : > { %355 = shalt.err (!%p352_p6)
}
  0x29   : > { %286 = dma.hbm_to_vmem [thread:$0]  (!%p508_p13), %s504_s28, 128, %s512_s30, %s113_s4  }
  0x2a   : > { %p595_p9 = scmp.lt.s32.totalorder %s420_s12, 3  ;;  %p596_p7 = scmp.ge.s32.totalorder %s420_s12, 1 }
  0x2c   : > { %p130_p0 = pnand %p596_p7, %p595_p9 }
  0x2d   : > { %s539_s25 = sand.u32 (!%p130_p0), 1, %s412_s10   ;;  %p597_p6 = scmp.ne.s32.totalorder (!%p130_p0), %s591_s20, 0 }
  0x2e   : > { %133 = sbr.rel (%p130_p0) target bundleno = 195 (0xc3), region = 28  ;;  %s270_s26 = sshll.u32 (!%p130_p0), %s539_s25, 3 }
  0x2f   : > { %s136_s27 = scalar_lea.sflag (!%p130_p0), [#allocation3], %s539_s25  ;;  %s139_s29 = scalar_lea.vmem (!%p130_p0), [#allocation2], %s270_s26 }
  0x33   : > { %399 = dma.done.wait (%p597_p6), %s136_s27, 128  }
  0x34   : > { %401 = vsyncadd (%p597_p6), %s136_s27, 4294967168  ;;  %v423_v0 = vmov 0   ;;  %v163_v1 = vld [vmem:[%s585_s0] sm:$0x3]  ;;  %v424_v2 = vmov 269488144   ;;  %v171_v4 = vlaneseq }
  0x35   : > { %327 = vset.pattern.permute.xlu0 %v423_v0  ;;  %v169_v3 = vunpack.c.l.s4 %v424_v2  ;;  %v162_v9 = vld [vmem:[%s139_s29] sm:$0xff]  ;;  %s278_s20 = sshll.u32 %s462_s13, 7  ;;  %s159_s3 = scalar_lea.vmem [#allocation5], %s270_s26 }
  0x36   : > { %166 = vperm.xlu0 %327, %v163_v1   ;;  %v172_v6 = vshrl.u32 %v171_v4, 7  ;;  %s193_s4 = sshll.u32 %s159_s3, 4  ;;  %s191_s7 = scalar_lea.hbm %s587_s2, %s278_s20  ;;  %s194_s4 = int_to_ptr.vmem [resolvable:$true] %s193_s4 }
  0x37   : > { %v170_v5 = vunpack.c.0.s8 %v169_v3  ;;  %s179_s8 = scalar_lea.sflag [#allocation4], %s539_s25  ;;  %s356_s14 = scalar_lea.vmem %s194_s4, 128 }
  0x38   : > { %p357_p11 = scmp.ne.s32.totalorder %s194_s4, %s356_s14  ;;  %p598_p12 = scmp.ne.s32.totalorder %s592_s21, 0 }
  0x39   : > { %v173_v7 = vsub.s32 %v170_v5, %v172_v6  ;;  %s425_s16 = smov [#allocation5]  }
  0x3a   : > { %p358_p13 = pnand %p357_p11, %p598_p12  ;;  %s360_s17 = sshll.u32 %s425_s16, 4  ;;  %s361_s17 = int_to_ptr.vmem [resolvable:$false] %s360_s17 }
  0x3b   : > { %s362_s13 = scalar_lea.vmem %s361_s17, 256  ;;  %p363_p3 = scmp.lt.s32.totalorder %s194_s4, %s361_s17 }
  0x3c   : > { %p359_p1 = pneg %p358_p13  ;;  %p364_p5 = scmp.lt.s32.totalorder %s362_s13, %s356_s14 }
  0x3e   : > { %p365_p8 = por %p364_p5, %p363_p3 }
  0x40   : > { %p366_p10 = pnand %p365_p8, %p359_p1 }
  0xb1   : > { %v167_v8 = vpop.permute.xlu0 %166 }
  0xb2   : > { %v174_v10 = vrot.slane %v167_v8, %v173_v7 }
  0xb4   : > { %v176_v11 = vmul.f32 %v174_v10, %v162_v9 }
  0xb6   : > { %177 = vst [vmem:[%s159_s3] sm:$0xff] %v176_v11 }
  0xb7   : > { %369 = shalt.err (!%p366_p10)
}
  0xb8   : > { %s370_s19 = scalar_lea.hbm %s191_s7, 128  ;;  %s374_s25 = scalar_lea.hbm %s587_s2, 256 }
  0xb9   : > { %p371_p2 = scmp.ne.s32.totalorder %s191_s7, %s370_s19  ;;  %p375_p7 = scmp.lt.s32.totalorder %s191_s7, %s587_s2 }
  0xba   : > { %p376_p0 = scmp.lt.s32.totalorder %s374_s25, %s370_s19 }
  0xbb   : > { %p372_p4 = pnand %p371_p2, %p598_p12 }
  0xbc   : > { %p377_p6 = por %p376_p0, %p375_p7 }
  0xbd   : > { %p373_p9 = pneg %p372_p4 }
  0xbf   : > { %p378_p11 = pnand %p377_p6, %p373_p9 }
  0xc1   : > { %381 = shalt.err (!%p378_p11)
}
  0xc2   : > { %281 = dma.vmem_to_hbm [thread:$0]  (%p598_p12), %s194_s4, 128, %s191_s7, %s179_s8  }
  0xc3 PF: > { %s205_s29 = sand.u32 1, %s408_s9   ;;  %p599_p13 = scmp.ne.s32.totalorder %s593_s22, 0 }
  0xc4   : > { %p600_p1 = scmp.ge.s32.totalorder %s420_s12, 2  ;;  %s206_s28 = scalar_lea.sflag [#allocation4], %s205_s29 }
  0xc6   : > { %p288_p3 = pnand %p600_p1, %p599_p13 }
  0xc8   : > { %p289_p5 = pneg %p288_p3 }
  0xca   : > { %403 = dma.done.wait (%p289_p5), %s206_s28, 128  }
  0xcb   : > { %405 = vsyncadd (%p289_p5), %s206_s28, 4294967168  ;;  %p15_p8 = scmp.ge.s32.totalorder %s466_s15, 4   ;;  %s601_s9 = smov %s412_s10 }
  0xcc   : > { %s602_s10 = smov %s416_s11  ;;  %s603_s11 = smov %s478_s18 }
  0xcd   : > { %s604_s12 = smov %s466_s15  ;;  %17 = sbr.rel (!%p15_p8) target bundleno = 5 (0x5), region = 73 }
  0xd2   :  { %211 = vsyncpa [#allocation3], 1 }
  0xd3   :  { %213 = vsyncpa [#allocation3 + $0x1], 1 }
  0xd4   :  { %214 = vsyncpa [#allocation4], 1 }
  0xd5   :  { %216 = vsyncpa [#allocation4 + $0x1], 1 }

</bundles_post_ra>
